<compile_context>
chip_gen: v6e
topology: v6e:2x2x1
jax: 0.10.0
libtpu: 0.0.40
codegen_flags: <defaults>
</compile_context>

<pallas_src>
import functools

import jax
import jax.numpy as jnp
from jax.experimental import pallas as pl
from jax.experimental.pallas import tpu as pltpu


def _clip_attn_kernel(x_ref, mask_ref, lnw_ref, lnb_ref,
                      wqkv_ref, bqkv_ref, wo_ref, bo_ref,
                      o_ref, *, num_heads, head_dim):
    """One batch element per grid step.

    x_ref    : (T, E)  f32   residual / LayerNorm input
    mask_ref : (T, T)  f32   additive attention mask
    lnw/lnb  : (1, E)  f32   LayerNorm affine params
    wqkv_ref : (E, 3E) bf16  [Wq^T * scale | Wk^T | Wv^T]
    bqkv_ref : (1, 3E) f32   [bq * scale   | bk   | bv  ]
    wo_ref   : (E, E)  bf16  Wo^T
    bo_ref   : (1, E)  f32
    o_ref    : (T, E)  f32
    """
    T, E = x_ref.shape
    Dh = head_dim

    x = x_ref[...]                                        # (T, E) f32

    # ---- LayerNorm (eps = 1e-5, affine), f32 VPU math ----
    mean = jnp.mean(x, axis=-1, keepdims=True)
    cen = x - mean
    var = jnp.mean(cen * cen, axis=-1, keepdims=True)
    ln = cen * jax.lax.rsqrt(var + 1e-5)
    ln = ln * lnw_ref[...] + lnb_ref[...]                 # (T, E)

    # ---- fused QKV projection: bf16 in, f32 accumulation ----
    qkv = jnp.dot(ln.astype(jnp.bfloat16), wqkv_ref[...],
                  preferred_element_type=jnp.float32) + bqkv_ref[...]  # (T, 3E)
    qkv_bf = qkv.astype(jnp.bfloat16)

    mask = mask_ref[...]                                  # (T, T) f32
    wo = wo_ref[...]                                      # (E, E) bf16

    # ---- per-head attention, with out_proj folded in and accumulated ----
    # TODO(synk): for very long sequences, tile the query axis (grid dim) and
    # switch to an online softmax instead of a full (T, T) logits tile.
    acc = jnp.zeros((T, E), jnp.float32)
    for h in range(num_heads):
        s = h * Dh
        qh = qkv_bf[:, s:s + Dh]                          # (T, Dh), pre-scaled
        kh = qkv_bf[:, E + s:E + s + Dh]                  # (T, Dh)
        vh = qkv_bf[:, 2 * E + s:2 * E + s + Dh]          # (T, Dh)

        logits = jnp.einsum('td,sd->ts', qh, kh,
                            preferred_element_type=jnp.float32)        # (T, T)
        logits = logits + mask
        m = jnp.max(logits, axis=-1, keepdims=True)
        p = jnp.exp(logits - m)
        p = p * pl.reciprocal(jnp.sum(p, axis=-1, keepdims=True), approx=True)

        ctx_h = jnp.dot(p.astype(jnp.bfloat16), vh,
                        preferred_element_type=jnp.float32)            # (T, Dh)
        # out_proj slice for this head: ctx_h @ (Wo^T)[s:s+Dh, :]
        acc = acc + jnp.dot(ctx_h.astype(jnp.bfloat16), wo[s:s + Dh, :],
                            preferred_element_type=jnp.float32)

    # ---- output bias + residual ----
    o_ref[...] = x + acc + bo_ref[...]


def clip_attention(x, attn_mask, params, *, num_heads):
    """x: (T, B, E) f32 (seq-first, as in the PyTorch module);
    attn_mask: (T, T) f32 additive mask.  Returns (T, B, E) f32."""
    T, B, E = x.shape
    Dh = E // num_heads
    scale = float(Dh) ** (-0.5)

    # Layout plumbing on the XLA side (keeps the kernel transpose-free).
    xb = jnp.transpose(x, (1, 0, 2))                      # (B, T, E)

    # Pre-transposed, fused, pre-scaled projection weights; bf16 for the MXU.
    wqkv_t = jnp.concatenate(
        [params['wq'].T * scale, params['wk'].T, params['wv'].T],
        axis=1).astype(jnp.bfloat16)                      # (E, 3E)
    bqkv = jnp.concatenate(
        [params['bq'] * scale, params['bk'], params['bv']]).reshape(1, 3 * E)
    wo_t = params['wo'].T.astype(jnp.bfloat16)            # (E, E)
    bo = params['bo'].reshape(1, E)
    lnw = params['ln_w'].reshape(1, E)
    lnb = params['ln_b'].reshape(1, E)

    kernel = functools.partial(_clip_attn_kernel,
                               num_heads=num_heads, head_dim=Dh)

    rep2 = lambda b: (0, 0)   # weights / mask / biases: same block every step
    out_b = pl.pallas_call(
        kernel,
        grid=(B,),
        in_specs=[
            pl.BlockSpec((None, T, E), lambda b: (b, 0, 0)),   # x (batch-major)
            pl.BlockSpec((T, T), rep2),                        # additive mask
            pl.BlockSpec((1, E), rep2),                        # ln_w
            pl.BlockSpec((1, E), rep2),                        # ln_b
            pl.BlockSpec((E, 3 * E), rep2),                    # Wqkv^T (fused)
            pl.BlockSpec((1, 3 * E), rep2),                    # bqkv
            pl.BlockSpec((E, E), rep2),                        # Wo^T
            pl.BlockSpec((1, E), rep2),                        # bo
        ],
        out_specs=pl.BlockSpec((None, T, E), lambda b: (b, 0, 0)),
        out_shape=jax.ShapeDtypeStruct((B, T, E), jnp.float32),
        compiler_params=pltpu.CompilerParams(
            dimension_semantics=("parallel",),                 # megacore on v7x
            vmem_limit_bytes=48 * 1024 * 1024),
    )(xb, attn_mask, lnw, lnb, wqkv_t, bqkv, wo_t, bo)

    return jnp.transpose(out_b, (1, 0, 2))                # back to (T, B, E)


def clip_attention_ref(x, attn_mask, params, *, num_heads):
    """Pure-JAX f32 reference mirroring the PyTorch base_forward()."""
    T, B, E = x.shape
    Dh = E // num_heads
    scale = float(Dh) ** (-0.5)

    xf = x.reshape(T * B, E)
    mean = jnp.mean(xf, axis=-1, keepdims=True)
    var = jnp.mean((xf - mean) ** 2, axis=-1, keepdims=True)
    ln = (xf - mean) / jnp.sqrt(var + 1e-5) * params['ln_w'] + params['ln_b']

    q = (ln @ params['wq'].T + params['bq']) * scale
    k = ln @ params['wk'].T + params['bk']
    v = ln @ params['wv'].T + params['bv']

    qh = q.reshape(T, B * num_heads, Dh).transpose(1, 0, 2)
    kh = k.reshape(T, B * num_heads, Dh).transpose(1, 0, 2)
    vh = v.reshape(T, B * num_heads, Dh).transpose(1, 0, 2)

    attn = jnp.einsum('bqd,bkd->bqk', qh, kh) + attn_mask[None]
    attn = jax.nn.softmax(attn, axis=-1)
    ctx = jnp.einsum('bqk,bkd->bqd', attn, vh)
    ctx = ctx.transpose(1, 0, 2).reshape(T * B, E)
    out = ctx @ params['wo'].T + params['bo']
    return (xf + out).reshape(T, B, E)


if __name__ == "__main__":
    # Small shapes: seq=8, batch=2, d_model=32, heads=4 (head_dim=8).
    T, B, E, H = 8, 2, 32, 4

    key = jax.random.PRNGKey(0)
    keys = jax.random.split(key, 12)

    x = jax.random.normal(keys[0], (T, B, E), dtype=jnp.float32)
    # Float additive 2D mask (tgt_len, src_len).
    attn_mask = 0.1 * jax.random.normal(keys[1], (T, T), dtype=jnp.float32)

    def lin_init(kw, kb, fan_in):
        bound = 1.0 / (fan_in ** 0.5)
        w = jax.random.uniform(kw, (E, E), jnp.float32, -bound, bound)
        b = jax.random.uniform(kb, (E,), jnp.float32, -bound, bound)
        return w, b

    wq, bq = lin_init(keys[2], keys[3], E)
    wk, bk = lin_init(keys[4], keys[5], E)
    wv, bv = lin_init(keys[6], keys[7], E)
    wo, bo = lin_init(keys[8], keys[9], E)

    params = {
        'wq': wq, 'bq': bq, 'wk': wk, 'bk': bk,
        'wv': wv, 'bv': bv, 'wo': wo, 'bo': bo,
        'ln_w': 1.0 + 0.05 * jax.random.normal(keys[10], (E,), jnp.float32),
        'ln_b': 0.05 * jax.random.normal(keys[11], (E,), jnp.float32),
    }

    out = clip_attention(x, attn_mask, params, num_heads=H)
    out = jax.block_until_ready(out)

    ref = clip_attention_ref(x, attn_mask, params, num_heads=H)
    assert out.shape == (T, B, E)
    # bf16 matmul operands (f32 accumulation) => relaxed tolerance vs f32 ref.
    max_err = jnp.max(jnp.abs(out - ref))
    assert jnp.allclose(out, ref, atol=2e-2, rtol=2e-2), \
        f"max abs err {max_err}"

    print("KERNEL_OK")
</pallas_src>

<mosaic_0001>
module attributes {stable_mosaic.version = 11 : i64} {
  func.func @_clip_attn_kernel(%arg0: i32, %arg1: memref<1x8x32xf32, #tpu.memory_space<vmem>>, %arg2: memref<8x8xf32, #tpu.memory_space<vmem>>, %arg3: memref<1x32xf32, #tpu.memory_space<vmem>>, %arg4: memref<1x32xf32, #tpu.memory_space<vmem>>, %arg5: memref<32x96xbf16, #tpu.memory_space<vmem>>, %arg6: memref<1x96xf32, #tpu.memory_space<vmem>>, %arg7: memref<32x32xbf16, #tpu.memory_space<vmem>>, %arg8: memref<1x32xf32, #tpu.memory_space<vmem>>, %arg9: memref<1x8x32xf32, #tpu.memory_space<vmem>>) attributes {dimension_semantics = [#tpu.dimension_semantics<parallel>], iteration_bounds = array<i64: 2>, scalar_prefetch = 0 : i64, scratch_operands = 0 : i64, tpu.core_type = #tpu.core_type<tc>, window_params = [{transform_indices = @transform_0, window_bounds = array<i64: 1, 8, 32>}, {pipeline_mode = #tpu.pipeline_mode<synchronous>, transform_indices = @transform_1, window_bounds = array<i64: 8, 8>}, {pipeline_mode = #tpu.pipeline_mode<synchronous>, transform_indices = @transform_2, window_bounds = array<i64: 1, 32>}, {pipeline_mode = #tpu.pipeline_mode<synchronous>, transform_indices = @transform_3, window_bounds = array<i64: 1, 32>}, {pipeline_mode = #tpu.pipeline_mode<synchronous>, transform_indices = @transform_4, window_bounds = array<i64: 32, 96>}, {pipeline_mode = #tpu.pipeline_mode<synchronous>, transform_indices = @transform_5, window_bounds = array<i64: 1, 96>}, {pipeline_mode = #tpu.pipeline_mode<synchronous>, transform_indices = @transform_6, window_bounds = array<i64: 32, 32>}, {pipeline_mode = #tpu.pipeline_mode<synchronous>, transform_indices = @transform_7, window_bounds = array<i64: 1, 32>}, {transform_indices = @transform_8, window_bounds = array<i64: 1, 8, 32>}]} {
    %c0 = arith.constant 0 : index
    %c0_0 = arith.constant 0 : index
    %c0_1 = arith.constant 0 : index
    %0 = vector.load %arg1[%c0, %c0_0, %c0_1] : memref<1x8x32xf32, #tpu.memory_space<vmem>>, vector<1x8x32xf32>
    %1 = vector.shape_cast %0 : vector<1x8x32xf32> to vector<8x32xf32>
    %cst = arith.constant dense<0.000000e+00> : vector<8xf32>
    %2 = vector.multi_reduction <add>, %1, %cst [1] : vector<8x32xf32> to vector<8xf32>
    %3 = vector.shape_cast %2 : vector<8xf32> to vector<8x1xf32>
    %cst_2 = arith.constant 3.200000e+01 : f32
    %4 = vector.broadcast %cst_2 : f32 to vector<8x1xf32>
    %5 = arith.divf %3, %4 : vector<8x1xf32>
    %6 = vector.broadcast %5 : vector<8x1xf32> to vector<8x32xf32>
    %7 = arith.subf %1, %6 : vector<8x32xf32>
    %8 = arith.mulf %7, %7 : vector<8x32xf32>
    %cst_3 = arith.constant dense<0.000000e+00> : vector<8xf32>
    %9 = vector.multi_reduction <add>, %8, %cst_3 [1] : vector<8x32xf32> to vector<8xf32>
    %10 = vector.shape_cast %9 : vector<8xf32> to vector<8x1xf32>
    %cst_4 = arith.constant 3.200000e+01 : f32
    %11 = vector.broadcast %cst_4 : f32 to vector<8x1xf32>
    %12 = arith.divf %10, %11 : vector<8x1xf32>
    %cst_5 = arith.constant 9.99999974E-6 : f32
    %13 = vector.broadcast %cst_5 : f32 to vector<8x1xf32>
    %14 = arith.addf %12, %13 : vector<8x1xf32>
    %15 = math.rsqrt %14 : vector<8x1xf32>
    %16 = vector.broadcast %15 : vector<8x1xf32> to vector<8x32xf32>
    %17 = arith.mulf %7, %16 : vector<8x32xf32>
    %c0_6 = arith.constant 0 : index
    %c0_7 = arith.constant 0 : index
    %18 = vector.load %arg3[%c0_6, %c0_7] : memref<1x32xf32, #tpu.memory_space<vmem>>, vector<1x32xf32>
    %19 = vector.broadcast %18 : vector<1x32xf32> to vector<8x32xf32>
    %20 = arith.mulf %17, %19 : vector<8x32xf32>
    %c0_8 = arith.constant 0 : index
    %c0_9 = arith.constant 0 : index
    %21 = vector.load %arg4[%c0_8, %c0_9] : memref<1x32xf32, #tpu.memory_space<vmem>>, vector<1x32xf32>
    %22 = vector.broadcast %21 : vector<1x32xf32> to vector<8x32xf32>
    %23 = arith.addf %20, %22 : vector<8x32xf32>
    %24 = arith.truncf %23 : vector<8x32xf32> to vector<8x32xbf16>
    %c0_10 = arith.constant 0 : index
    %c0_11 = arith.constant 0 : index
    %25 = vector.load %arg5[%c0_10, %c0_11] : memref<32x96xbf16, #tpu.memory_space<vmem>>, vector<32x96xbf16>
    %cst_12 = arith.constant dense<0.000000e+00> : vector<8x96xf32>
    %26 = tpu.matmul %24, %25, %cst_12 {dimension_numbers = #tpu.dot_dimension_numbers<[1], [0], [0], [1], [0, 0, 1, 1], [], []>} : vector<8x32xbf16>, vector<32x96xbf16>, vector<8x96xf32> -> vector<8x96xf32>
    %c0_13 = arith.constant 0 : index
    %c0_14 = arith.constant 0 : index
    %27 = vector.load %arg6[%c0_13, %c0_14] : memref<1x96xf32, #tpu.memory_space<vmem>>, vector<1x96xf32>
    %28 = vector.broadcast %27 : vector<1x96xf32> to vector<8x96xf32>
    %29 = arith.addf %26, %28 : vector<8x96xf32>
    %30 = arith.truncf %29 : vector<8x96xf32> to vector<8x96xbf16>
    %c0_15 = arith.constant 0 : index
    %c0_16 = arith.constant 0 : index
    %31 = vector.load %arg2[%c0_15, %c0_16] : memref<8x8xf32, #tpu.memory_space<vmem>>, vector<8x8xf32>
    %c0_17 = arith.constant 0 : index
    %c0_18 = arith.constant 0 : index
    %32 = vector.load %arg7[%c0_17, %c0_18] : memref<32x32xbf16, #tpu.memory_space<vmem>>, vector<32x32xbf16>
    %cst_19 = arith.constant 0.000000e+00 : f32
    %33 = vector.broadcast %cst_19 : f32 to vector<8x32xf32>
    %34 = vector.extract_strided_slice %30 {offsets = [0, 0], sizes = [8, 8], strides = [1, 1]} : vector<8x96xbf16> to vector<8x8xbf16>
    %35 = vector.extract_strided_slice %30 {offsets = [0, 32], sizes = [8, 8], strides = [1, 1]} : vector<8x96xbf16> to vector<8x8xbf16>
    %36 = vector.extract_strided_slice %30 {offsets = [0, 64], sizes = [8, 8], strides = [1, 1]} : vector<8x96xbf16> to vector<8x8xbf16>
    "tpu.trace_start"() <{level = 10 : i32, message = "td,sd->ts"}> : () -> ()
    %cst_20 = arith.constant dense<0.000000e+00> : vector<8x8xf32>
    %37 = tpu.matmul %34, %35, %cst_20 {dimension_numbers = #tpu.dot_dimension_numbers<[1], [1], [0], [0], [0, 0, 1, 0], [], []>} : vector<8x8xbf16>, vector<8x8xbf16>, vector<8x8xf32> -> vector<8x8xf32>
    "tpu.trace_stop"() : () -> ()
    %38 = arith.addf %37, %31 : vector<8x8xf32>
    %cst_21 = arith.constant dense<0xFF800000> : vector<8xf32>
    %39 = vector.multi_reduction <maximumf>, %38, %cst_21 [1] : vector<8x8xf32> to vector<8xf32>
    %40 = vector.shape_cast %39 : vector<8xf32> to vector<8x1xf32>
    %41 = vector.broadcast %40 : vector<8x1xf32> to vector<8x8xf32>
    %42 = arith.subf %38, %41 : vector<8x8xf32>
    %43 = math.exp %42 : vector<8x8xf32>
    %cst_22 = arith.constant dense<0.000000e+00> : vector<8xf32>
    %44 = vector.multi_reduction <add>, %43, %cst_22 [1] : vector<8x8xf32> to vector<8xf32>
    %45 = vector.shape_cast %44 : vector<8xf32> to vector<8x1xf32>
    %46 = tpu.reciprocal %45 {approx = true} : vector<8x1xf32> -> vector<8x1xf32>
    %47 = vector.broadcast %46 : vector<8x1xf32> to vector<8x8xf32>
    %48 = arith.mulf %43, %47 : vector<8x8xf32>
    %49 = arith.truncf %48 : vector<8x8xf32> to vector<8x8xbf16>
    %cst_23 = arith.constant dense<0.000000e+00> : vector<8x8xf32>
    %50 = tpu.matmul %49, %36, %cst_23 {dimension_numbers = #tpu.dot_dimension_numbers<[1], [0], [0], [1], [0, 0, 1, 1], [], []>} : vector<8x8xbf16>, vector<8x8xbf16>, vector<8x8xf32> -> vector<8x8xf32>
    %51 = arith.truncf %50 : vector<8x8xf32> to vector<8x8xbf16>
    %52 = vector.extract_strided_slice %32 {offsets = [0, 0], sizes = [8, 32], strides = [1, 1]} : vector<32x32xbf16> to vector<8x32xbf16>
    %cst_24 = arith.constant dense<0.000000e+00> : vector<8x32xf32>
    %53 = tpu.matmul %51, %52, %cst_24 {dimension_numbers = #tpu.dot_dimension_numbers<[1], [0], [0], [1], [0, 0, 1, 1], [], []>} : vector<8x8xbf16>, vector<8x32xbf16>, vector<8x32xf32> -> vector<8x32xf32>
    %54 = arith.addf %33, %53 : vector<8x32xf32>
    %55 = vector.extract_strided_slice %30 {offsets = [0, 8], sizes = [8, 8], strides = [1, 1]} : vector<8x96xbf16> to vector<8x8xbf16>
    %56 = vector.extract_strided_slice %30 {offsets = [0, 40], sizes = [8, 8], strides = [1, 1]} : vector<8x96xbf16> to vector<8x8xbf16>
    %57 = vector.extract_strided_slice %30 {offsets = [0, 72], sizes = [8, 8], strides = [1, 1]} : vector<8x96xbf16> to vector<8x8xbf16>
    "tpu.trace_start"() <{level = 10 : i32, message = "td,sd->ts"}> : () -> ()
    %cst_25 = arith.constant dense<0.000000e+00> : vector<8x8xf32>
    %58 = tpu.matmul %55, %56, %cst_25 {dimension_numbers = #tpu.dot_dimension_numbers<[1], [1], [0], [0], [0, 0, 1, 0], [], []>} : vector<8x8xbf16>, vector<8x8xbf16>, vector<8x8xf32> -> vector<8x8xf32>
    "tpu.trace_stop"() : () -> ()
    %59 = arith.addf %58, %31 : vector<8x8xf32>
    %cst_26 = arith.constant dense<0xFF800000> : vector<8xf32>
    %60 = vector.multi_reduction <maximumf>, %59, %cst_26 [1] : vector<8x8xf32> to vector<8xf32>
    %61 = vector.shape_cast %60 : vector<8xf32> to vector<8x1xf32>
    %62 = vector.broadcast %61 : vector<8x1xf32> to vector<8x8xf32>
    %63 = arith.subf %59, %62 : vector<8x8xf32>
    %64 = math.exp %63 : vector<8x8xf32>
    %cst_27 = arith.constant dense<0.000000e+00> : vector<8xf32>
    %65 = vector.multi_reduction <add>, %64, %cst_27 [1] : vector<8x8xf32> to vector<8xf32>
    %66 = vector.shape_cast %65 : vector<8xf32> to vector<8x1xf32>
    %67 = tpu.reciprocal %66 {approx = true} : vector<8x1xf32> -> vector<8x1xf32>
    %68 = vector.broadcast %67 : vector<8x1xf32> to vector<8x8xf32>
    %69 = arith.mulf %64, %68 : vector<8x8xf32>
    %70 = arith.truncf %69 : vector<8x8xf32> to vector<8x8xbf16>
    %cst_28 = arith.constant dense<0.000000e+00> : vector<8x8xf32>
    %71 = tpu.matmul %70, %57, %cst_28 {dimension_numbers = #tpu.dot_dimension_numbers<[1], [0], [0], [1], [0, 0, 1, 1], [], []>} : vector<8x8xbf16>, vector<8x8xbf16>, vector<8x8xf32> -> vector<8x8xf32>
    %72 = arith.truncf %71 : vector<8x8xf32> to vector<8x8xbf16>
    %73 = vector.extract_strided_slice %32 {offsets = [8, 0], sizes = [8, 32], strides = [1, 1]} : vector<32x32xbf16> to vector<8x32xbf16>
    %cst_29 = arith.constant dense<0.000000e+00> : vector<8x32xf32>
    %74 = tpu.matmul %72, %73, %cst_29 {dimension_numbers = #tpu.dot_dimension_numbers<[1], [0], [0], [1], [0, 0, 1, 1], [], []>} : vector<8x8xbf16>, vector<8x32xbf16>, vector<8x32xf32> -> vector<8x32xf32>
    %75 = arith.addf %54, %74 : vector<8x32xf32>
    %76 = vector.extract_strided_slice %30 {offsets = [0, 16], sizes = [8, 8], strides = [1, 1]} : vector<8x96xbf16> to vector<8x8xbf16>
    %77 = vector.extract_strided_slice %30 {offsets = [0, 48], sizes = [8, 8], strides = [1, 1]} : vector<8x96xbf16> to vector<8x8xbf16>
    %78 = vector.extract_strided_slice %30 {offsets = [0, 80], sizes = [8, 8], strides = [1, 1]} : vector<8x96xbf16> to vector<8x8xbf16>
    "tpu.trace_start"() <{level = 10 : i32, message = "td,sd->ts"}> : () -> ()
    %cst_30 = arith.constant dense<0.000000e+00> : vector<8x8xf32>
    %79 = tpu.matmul %76, %77, %cst_30 {dimension_numbers = #tpu.dot_dimension_numbers<[1], [1], [0], [0], [0, 0, 1, 0], [], []>} : vector<8x8xbf16>, vector<8x8xbf16>, vector<8x8xf32> -> vector<8x8xf32>
    "tpu.trace_stop"() : () -> ()
    %80 = arith.addf %79, %31 : vector<8x8xf32>
    %cst_31 = arith.constant dense<0xFF800000> : vector<8xf32>
    %81 = vector.multi_reduction <maximumf>, %80, %cst_31 [1] : vector<8x8xf32> to vector<8xf32>
    %82 = vector.shape_cast %81 : vector<8xf32> to vector<8x1xf32>
    %83 = vector.broadcast %82 : vector<8x1xf32> to vector<8x8xf32>
    %84 = arith.subf %80, %83 : vector<8x8xf32>
    %85 = math.exp %84 : vector<8x8xf32>
    %cst_32 = arith.constant dense<0.000000e+00> : vector<8xf32>
    %86 = vector.multi_reduction <add>, %85, %cst_32 [1] : vector<8x8xf32> to vector<8xf32>
    %87 = vector.shape_cast %86 : vector<8xf32> to vector<8x1xf32>
    %88 = tpu.reciprocal %87 {approx = true} : vector<8x1xf32> -> vector<8x1xf32>
    %89 = vector.broadcast %88 : vector<8x1xf32> to vector<8x8xf32>
    %90 = arith.mulf %85, %89 : vector<8x8xf32>
    %91 = arith.truncf %90 : vector<8x8xf32> to vector<8x8xbf16>
    %cst_33 = arith.constant dense<0.000000e+00> : vector<8x8xf32>
    %92 = tpu.matmul %91, %78, %cst_33 {dimension_numbers = #tpu.dot_dimension_numbers<[1], [0], [0], [1], [0, 0, 1, 1], [], []>} : vector<8x8xbf16>, vector<8x8xbf16>, vector<8x8xf32> -> vector<8x8xf32>
    %93 = arith.truncf %92 : vector<8x8xf32> to vector<8x8xbf16>
    %94 = vector.extract_strided_slice %32 {offsets = [16, 0], sizes = [8, 32], strides = [1, 1]} : vector<32x32xbf16> to vector<8x32xbf16>
    %cst_34 = arith.constant dense<0.000000e+00> : vector<8x32xf32>
    %95 = tpu.matmul %93, %94, %cst_34 {dimension_numbers = #tpu.dot_dimension_numbers<[1], [0], [0], [1], [0, 0, 1, 1], [], []>} : vector<8x8xbf16>, vector<8x32xbf16>, vector<8x32xf32> -> vector<8x32xf32>
    %96 = arith.addf %75, %95 : vector<8x32xf32>
    %97 = vector.extract_strided_slice %30 {offsets = [0, 24], sizes = [8, 8], strides = [1, 1]} : vector<8x96xbf16> to vector<8x8xbf16>
    %98 = vector.extract_strided_slice %30 {offsets = [0, 56], sizes = [8, 8], strides = [1, 1]} : vector<8x96xbf16> to vector<8x8xbf16>
    %99 = vector.extract_strided_slice %30 {offsets = [0, 88], sizes = [8, 8], strides = [1, 1]} : vector<8x96xbf16> to vector<8x8xbf16>
    "tpu.trace_start"() <{level = 10 : i32, message = "td,sd->ts"}> : () -> ()
    %cst_35 = arith.constant dense<0.000000e+00> : vector<8x8xf32>
    %100 = tpu.matmul %97, %98, %cst_35 {dimension_numbers = #tpu.dot_dimension_numbers<[1], [1], [0], [0], [0, 0, 1, 0], [], []>} : vector<8x8xbf16>, vector<8x8xbf16>, vector<8x8xf32> -> vector<8x8xf32>
    "tpu.trace_stop"() : () -> ()
    %101 = arith.addf %100, %31 : vector<8x8xf32>
    %cst_36 = arith.constant dense<0xFF800000> : vector<8xf32>
    %102 = vector.multi_reduction <maximumf>, %101, %cst_36 [1] : vector<8x8xf32> to vector<8xf32>
    %103 = vector.shape_cast %102 : vector<8xf32> to vector<8x1xf32>
    %104 = vector.broadcast %103 : vector<8x1xf32> to vector<8x8xf32>
    %105 = arith.subf %101, %104 : vector<8x8xf32>
    %106 = math.exp %105 : vector<8x8xf32>
    %cst_37 = arith.constant dense<0.000000e+00> : vector<8xf32>
    %107 = vector.multi_reduction <add>, %106, %cst_37 [1] : vector<8x8xf32> to vector<8xf32>
    %108 = vector.shape_cast %107 : vector<8xf32> to vector<8x1xf32>
    %109 = tpu.reciprocal %108 {approx = true} : vector<8x1xf32> -> vector<8x1xf32>
    %110 = vector.broadcast %109 : vector<8x1xf32> to vector<8x8xf32>
    %111 = arith.mulf %106, %110 : vector<8x8xf32>
    %112 = arith.truncf %111 : vector<8x8xf32> to vector<8x8xbf16>
    %cst_38 = arith.constant dense<0.000000e+00> : vector<8x8xf32>
    %113 = tpu.matmul %112, %99, %cst_38 {dimension_numbers = #tpu.dot_dimension_numbers<[1], [0], [0], [1], [0, 0, 1, 1], [], []>} : vector<8x8xbf16>, vector<8x8xbf16>, vector<8x8xf32> -> vector<8x8xf32>
    %114 = arith.truncf %113 : vector<8x8xf32> to vector<8x8xbf16>
    %115 = vector.extract_strided_slice %32 {offsets = [24, 0], sizes = [8, 32], strides = [1, 1]} : vector<32x32xbf16> to vector<8x32xbf16>
    %cst_39 = arith.constant dense<0.000000e+00> : vector<8x32xf32>
    %116 = tpu.matmul %114, %115, %cst_39 {dimension_numbers = #tpu.dot_dimension_numbers<[1], [0], [0], [1], [0, 0, 1, 1], [], []>} : vector<8x8xbf16>, vector<8x32xbf16>, vector<8x32xf32> -> vector<8x32xf32>
    %117 = arith.addf %96, %116 : vector<8x32xf32>
    %118 = arith.addf %1, %117 : vector<8x32xf32>
    %c0_40 = arith.constant 0 : index
    %c0_41 = arith.constant 0 : index
    %119 = vector.load %arg8[%c0_40, %c0_41] : memref<1x32xf32, #tpu.memory_space<vmem>>, vector<1x32xf32>
    %120 = vector.broadcast %119 : vector<1x32xf32> to vector<8x32xf32>
    %121 = arith.addf %118, %120 : vector<8x32xf32>
    %c0_42 = arith.constant 0 : index
    %c0_43 = arith.constant 0 : index
    %c0_44 = arith.constant 0 : index
    %122 = vector.load %arg9[%c0_42, %c0_43, %c0_44] : memref<1x8x32xf32, #tpu.memory_space<vmem>>, vector<1x8x32xf32>
    %123 = vector.shape_cast %122 : vector<1x8x32xf32> to vector<8x32xf32>
    %124 = vector.shape_cast %121 : vector<8x32xf32> to vector<1x8x32xf32>
    tpu.vector_store %arg9[%c0_42, %c0_43, %c0_44], %124 {strides = array<i32>} : memref<1x8x32xf32, #tpu.memory_space<vmem>>, vector<1x8x32xf32>,
    return
  }
  func.func @transform_0(%arg0: i32) -> (i32, i32, i32) {
    %c0_i32 = arith.constant 0 : i32
    %c0_i32_0 = arith.constant 0 : i32
    %c0_i32_1 = arith.constant 0 : i32
    return %arg0, %c0_i32, %c0_i32_0 : i32, i32, i32
  }
  func.func @transform_1(%arg0: i32) -> (i32, i32) {
    %c0_i32 = arith.constant 0 : i32
    %c0_i32_0 = arith.constant 0 : i32
    %c0_i32_1 = arith.constant 0 : i32
    return %c0_i32, %c0_i32_0 : i32, i32
  }
  func.func @transform_2(%arg0: i32) -> (i32, i32) {
    %c0_i32 = arith.constant 0 : i32
    %c0_i32_0 = arith.constant 0 : i32
    %c0_i32_1 = arith.constant 0 : i32
    return %c0_i32, %c0_i32_0 : i32, i32
  }
  func.func @transform_3(%arg0: i32) -> (i32, i32) {
    %c0_i32 = arith.constant 0 : i32
    %c0_i32_0 = arith.constant 0 : i32
    %c0_i32_1 = arith.constant 0 : i32
    return %c0_i32, %c0_i32_0 : i32, i32
  }
  func.func @transform_4(%arg0: i32) -> (i32, i32) {
    %c0_i32 = arith.constant 0 : i32
    %c0_i32_0 = arith.constant 0 : i32
    %c0_i32_1 = arith.constant 0 : i32
    return %c0_i32, %c0_i32_0 : i32, i32
  }
  func.func @transform_5(%arg0: i32) -> (i32, i32) {
    %c0_i32 = arith.constant 0 : i32
    %c0_i32_0 = arith.constant 0 : i32
    %c0_i32_1 = arith.constant 0 : i32
    return %c0_i32, %c0_i32_0 : i32, i32
  }
  func.func @transform_6(%arg0: i32) -> (i32, i32) {
    %c0_i32 = arith.constant 0 : i32
    %c0_i32_0 = arith.constant 0 : i32
    %c0_i32_1 = arith.constant 0 : i32
    return %c0_i32, %c0_i32_0 : i32, i32
  }
  func.func @transform_7(%arg0: i32) -> (i32, i32) {
    %c0_i32 = arith.constant 0 : i32
    %c0_i32_0 = arith.constant 0 : i32
    %c0_i32_1 = arith.constant 0 : i32
    return %c0_i32, %c0_i32_0 : i32, i32
  }
  func.func @transform_8(%arg0: i32) -> (i32, i32, i32) {
    %c0_i32 = arith.constant 0 : i32
    %c0_i32_0 = arith.constant 0 : i32
    %c0_i32_1 = arith.constant 0 : i32
    return %arg0, %c0_i32, %c0_i32_0 : i32, i32, i32
  }
}

</mosaic_0001>

<bundles_post_ra>
// kernel: tpu_custom_call.1
= control target key start
LH: loop header
LB: loop body
LE: loop exit
PB: predicated region body
PF: predicated region fallthrough
CT: control target
= control target key end

     0   :  { %s2027_s0 = inlined_call_operand.hbm [shape: f32[2,8,32], index: 0, kind: input, shape index: {}]   ;;  %s2028_s1 = inlined_call_operand.hbm [shape: f32[8,8], index: 1, kind: input, shape index: {}]   ;;  %s2029_s2 = inlined_call_operand.vmem [shape: f32[1,32], index: 2, kind: input, shape index: {}]   ;;  %s2030_s3 = inlined_call_operand.vmem [shape: f32[1,32], index: 3, kind: input, shape index: {}]   ;;  %s2031_s4 = inlined_call_operand.hbm [shape: bf16[32,96], index: 4, kind: input, shape index: {}]   ;;  %s2032_s5 = inlined_call_operand.vmem [shape: f32[1,96], index: 5, kind: input, shape index: {}]   ;;  %s2033_s6 = inlined_call_operand.hbm [shape: bf16[32,32], index: 6, kind: input, shape index: {}]   ;;  %s2034_s7 = inlined_call_operand.vmem [shape: f32[1,32], index: 7, kind: input, shape index: {}]   ;;  %s2035_s8 = inlined_call_operand.hbm [shape: f32[2,8,32], index: 8, kind: output, shape index: {}]  }
   0x1   :  { %2040 = sst [smem:[#allocation15_spill]] %s2028_s1 }
   0x2   :  { %2041 = sst [smem:[#allocation16_spill]] %s2031_s4 }
   0x3   :  { %2042 = sst [smem:[#allocation17_spill]] %s2033_s6 }
   0x4   :  { %13 = vsyncpa [#allocation3], 0 }
   0x5   :  { %15 = vsyncpa [#allocation3 + $0x1], 0 }
   0x6   :  { %16 = vsyncpa [#allocation6], 0 }
   0x7   :  { %17 = vsyncpa [#allocation9], 0 }
   0x8   :  { %18 = vsyncpa [#allocation4], 0 }
   0x9   :  { %20 = vsyncpa [#allocation4 + $0x1], 0  ;;  %s1724_s27 = smov 0   ;;  %s1726_s28 = smov 0  }
   0xa   :  { %s1728_s29 = smov 0   ;;  %s1730_s30 = smov 0  }
   0xb LB: > { %s1745_s9 = sadd.s32 4294967295, %s1657_s30   ;;  %s1223_s10 = sadd.s32 4294967294, %s1657_s30   ;;  %s1657_s30 = sphi %s1730_s30, %s2065_s30   ;;  %s1653_s29 = sphi %s1728_s29, %s2064_s29   ;;  %s1649_s28 = sphi %s1726_s28, %s2063_s28   ;;  %s1645_s27 = sphi %s1724_s27, %s2062_s27  }
   0xc   : > { %p46_p0 = scmp.ne.s32.totalorder %s1649_s28, %s1645_s27  ;;  %p2036_p1 = scmp.eq.s32.totalorder %s1745_s9, 0 }
   0xd   : > { %p223_p3 = scmp.eq.s32.totalorder %s1223_s10, 1  ;;  %p1224_p5 = scmp.ge.s32.totalorder %s1657_s30, 1 }
   0xe   : > { %p1754_p4 = por %p2036_p1, %p46_p0  ;;  %p230_p7 = scmp.lt.s32.totalorder %s1657_s30, 3 }
   0xf   : > { %p1759_p6 = por %p223_p3, %p46_p0  ;;  %s1659_s14 = smov [#allocation5]  }
  0x10   : > { %s2043_s11 = scalar_select %p1754_p4, 1, 0 }
  0x11   : > { %s2044_s12 = scalar_select %p1759_p6, 1, 0 }
  0x12   : > { %p1764_p8 = pnand %p1224_p5, %p230_p7  ;;  %s243_s15 = sshll.u32 %s1659_s14, 4  ;;  %s244_s15 = int_to_ptr.vmem [resolvable:$true] %s243_s15 }
  0x13   : > { %s1660_s16 = smov [#allocation7]   ;;  %s1661_s19 = smov [#allocation8]  }
  0x14   : > { %s2045_s13 = scalar_select %p1764_p8, 1, 0 }
  0x15   : > { %p1383_p10 = pneg %p1764_p8  ;;  %s259_s17 = sshll.u32 %s1660_s16, 4  ;;  %s260_s17 = int_to_ptr.vmem [resolvable:$true] %s259_s17 }
  0x16   : > { %s275_s20 = sshll.u32 %s1661_s19, 4  ;;  %s1490_s21 = scalar_lea.vmem %s244_s15, 128  ;;  %s276_s20 = int_to_ptr.vmem [resolvable:$true] %s275_s20 }
  0x17   : > { %p1773_p11 = pnand %p1383_p10, %p2036_p1  ;;  %p1491_p13 = scmp.ne.s32.totalorder %s244_s15, %s1490_s21 }
  0x18   : > { %p1498_p5 = scmp.lt.s32.totalorder %s244_s15, %s244_s15  ;;  %p1499_p7 = scmp.lt.s32.totalorder %s1490_s21, %s1490_s21 }
  0x19   : > { %p1481_p12 = pneg %p1773_p11 }
  0x1a   : > { %p1500_p9 = por %p1499_p7, %p1498_p5 }
  0x1b   : > { %p1493_p0 = pnand %p1491_p13, %p1481_p12 }
  0x1d   : > { %p1494_p3 = pneg %p1493_p0 }
  0x1f   : > { %p1501_p10 = pnand %p1500_p9, %p1494_p3 }
  0x21   : > { %1504 = shalt.err (!%p1501_p10)
}
  0x22   : > { %s2047_s1 = sld [smem:[#allocation15_spill]]  ;;  %s1516_s24 = scalar_lea.vmem %s260_s17, 256 }
  0x23   : > { %p1517_p1 = scmp.ne.s32.totalorder %s260_s17, %s1516_s24  ;;  %p1524_p13 = scmp.lt.s32.totalorder %s260_s17, %s260_s17 }
  0x24   : > { %p1525_p0 = scmp.lt.s32.totalorder %s1516_s24, %s1516_s24 }
  0x25   : > { %p1519_p2 = pnand %p1517_p1, %p1481_p12 }
  0x26   : > { %p1526_p4 = por %p1525_p0, %p1524_p13 }
  0x27   : > { %p1520_p6 = pneg %p1519_p2 }
  0x28   : > { %1386 = dma.hbm_to_vmem [thread:$0]  (!%p1773_p11), %s2047_s1, 128, %s244_s15, [#allocation6]  }
  0x29   : > { %p1527_p8 = pnand %p1526_p4, %p1520_p6 }
  0x2b   : > { %1530 = shalt.err (!%p1527_p8)
}
  0x2c   : > { %s1662_s25 = smov 64   ;;  %s1663_s26 = smov 4  }
  0x2d   : > { %s2048_s4 = sld [smem:[#allocation16_spill]]  ;;  %s1542_s15 = scalar_lea.vmem %s276_s20, 256 }
  0x2e   : > { %p1543_p9 = scmp.ne.s32.totalorder %s276_s20, %s1542_s15  ;;  %p1550_p3 = scmp.lt.s32.totalorder %s276_s20, %s276_s20 }
  0x2f   : > { %p1551_p5 = scmp.lt.s32.totalorder %s1542_s15, %s1542_s15 }
  0x30   : > { %p1545_p1 = pnand %p1543_p9, %p1481_p12 }
  0x31   : > { %p1552_p4 = por %p1551_p5, %p1550_p3 }
  0x32   : > { %p1546_p2 = pneg %p1545_p1 }
  0x33   : > { %1389 = dma.hbm_to_vmem [thread:$0]  (!%p1773_p11), %s2048_s4, 256, %s260_s17, [#allocation6], %s1662_s25, %s1662_s25, %s1663_s26  }
  0x34   : > { %p1553_p6 = pnand %p1552_p4, %p1546_p2 }
  0x36   : > { %1556 = shalt.err (!%p1553_p6)
}
  0x37   : > { %s2049_s6 = sld [smem:[#allocation17_spill]]  ;;  %s1804_s17 = sadd.s32 1, %s1657_s30  }
  0x38   : > { %s30_s21 = ssub.s32 %s1657_s30, %s1804_s17  ;;  %s33_s18 = sadd.s32 1, %s1653_s29 }
  0x39   : > { %p31_p8 = scmp.eq.s32.totalorder %s30_s21, 0  ;;  %p40_p12 = scmp.ne.s32.totalorder %s1653_s29, %s1649_s28 }
  0x3a   : > { %p41_p7 = scmp.eq.s32.totalorder %s1657_s30, 0  ;;  %p1404_p10 = scmp.lt.s32.totalorder %s1657_s30, 2 }
  0x3b   : > { %s1814_s22 = scalar_select %p31_p8, %s1653_s29, %s33_s18  }
  0x3c   : > { %p42_p13 = por %p41_p7, %p40_p12  ;;  %p2050_p0 = scmp.eq.s32.totalorder %s1745_s9, 1 }
  0x3d   : > { %1392 = dma.hbm_to_vmem [thread:$0]  (!%p1773_p11), %s2049_s6, 256, %s276_s20, [#allocation9], %s1662_s25, %s1662_s25, %s1663_s26  }
  0x3e   : > { %p1818_p9 = por %p2050_p0, %p40_p12  ;;  %s292_s24 = sand.u32 1, %s1653_s29  }
  0x3f   : > { %s1230_s10 = sshll.u32 %s1657_s30, 7  ;;  %s1229_s20 = sshll.u32 %s292_s24, 3 }
  0x40   : > { %s2051_s23 = scalar_select %p1818_p9, 1, 0 }
  0x41   : > { %s1827_s14 = scalar_lea.hbm %s2027_s0, %s1230_s10  ;;  %s296_s15 = scalar_lea.vmem [#allocation2], %s1229_s20 }
  0x42   : > { %s303_s16 = sshll.u32 %s296_s15, 4  ;;  %p1829_p11 = pnand %p1404_p10, %p42_p13  ;;  %s304_s16 = int_to_ptr.vmem [resolvable:$true] %s303_s16 }
  0x43   : > { %s293_s21 = scalar_lea.sflag [#allocation3], %s292_s24  ;;  %s1557_s18 = scalar_lea.hbm %s1827_s14, 128 }
  0x44   : > { %p1558_p1 = scmp.ne.s32.totalorder %s1827_s14, %s1557_s18  ;;  %p1559_p2 = pneg %p1829_p11 }
  0x45   : > { %s1562_s26 = scalar_lea.hbm %s2027_s0, 256  ;;  %p1563_p4 = scmp.lt.s32.totalorder %s1827_s14, %s2027_s0 }
  0x46   : > { %p1560_p3 = pnand %p1559_p2, %p1558_p1  ;;  %p1564_p6 = scmp.lt.s32.totalorder %s1562_s26, %s1557_s18 }
  0x48   : > { %p1561_p5 = pneg %p1560_p3  ;;  %p1565_p8 = por %p1564_p6, %p1563_p4 }
  0x4a   : > { %p1566_p12 = pnand %p1565_p8, %p1561_p5 }
  0x4c   : > { %1569 = shalt.err (!%p1566_p12)
}
  0x4d   : > { %s1570_s15 = scalar_lea.vmem %s304_s16, 128  ;;  %s1664_s24 = smov [#allocation2]  }
  0x4e   : > { %p1571_p7 = scmp.ne.s32.totalorder %s304_s16, %s1570_s15  ;;  %s1575_s4 = sshll.u32 %s1664_s24, 4  ;;  %s1576_s4 = int_to_ptr.vmem [resolvable:$false] %s1575_s4 }
  0x4f   : > { %s1577_s6 = scalar_lea.vmem %s1576_s4, 256  ;;  %p1578_p0 = scmp.lt.s32.totalorder %s304_s16, %s1576_s4 }
  0x50   : > { %p1573_p10 = pnand %p1571_p7, %p1559_p2  ;;  %p1579_p1 = scmp.lt.s32.totalorder %s1577_s6, %s1570_s15 }
  0x52   : > { %p1574_p13 = pneg %p1573_p10  ;;  %p1580_p3 = por %p1579_p1, %p1578_p0 }
  0x54   : > { %p1581_p9 = pnand %p1580_p3, %p1574_p13 }
  0x56   : > { %1584 = shalt.err (!%p1581_p9)
}
  0x57   : > { %1396 = dma.hbm_to_vmem [thread:$0]  (!%p1829_p11), %s1827_s14, 128, %s304_s16, %s293_s21  }
  0x58   : > { %p2053_p5 = scmp.ne.s32.totalorder %s2045_s13, 0 }
  0x59   : > { %s1850_s1 = sand.u32 (!%p2053_p5), 1, %s1649_s28   ;;  %p2054_p2 = scmp.ne.s32.totalorder (!%p2053_p5), %s2043_s11, 0 }
  0x5a   : > { %312 = sbr.rel (%p2053_p5) target bundleno = 2886 (0xb46), region = 52  ;;  %s1232_s18 = sshll.u32 (!%p2053_p5), %s1850_s1, 3 }
  0x5b   : > { %s315_s4 = scalar_lea.sflag (!%p2053_p5), [#allocation3], %s1850_s1  ;;  %s318_s6 = scalar_lea.vmem (!%p2053_p5), [#allocation2], %s1232_s18 }
  0x5f   : > { %1628 = dma.done.wait (%p2054_p2), %s315_s4, 128  }
  0x60   : > { %1630 = vsyncadd (%p2054_p2), %s315_s4, 4294967168  ;;  %p2055_p9 = scmp.eq.s32.totalorder %s1745_s9, 0 }
  0x62   : > { %1632 = dma.done.wait (%p2055_p9), [#allocation6], 384   ;;  %p2056_p11 = pmov %p2055_p9 }
  0x63   : > { %p2057_p4 = pmov %p2055_p9 }
  0x64   : > { %1634 = vsyncadd (%p2056_p11), [#allocation6], 4294966912 }
  0x65   : > { %1636 = dma.done.wait (%p2057_p4), [#allocation9], 256   ;;  %p2058_p6 = pmov %p2057_p4 }
  0x66   : > { %vm365_vm0 = vcmask 261120   ;;  %v1868_v0 = vld [vmem:[%s318_s6] sm:$0xff]  ;;  %v1665_v8 = vmov 0.0   ;;  %vm1666_vm1 = vmmov 0   ;;  %v1460_v9 = vld [vmem:[#allocation7] sm:$0xff]   ;;  %s1667_s10 = smov 120  }
  0x67   : > { %1638 = vsyncadd (%p2058_p6), [#allocation9], 4294967040  ;;  %v366_v1 = vsel %vm365_vm0, %v1868_v0, 0.0  ;;  %v1459_v7 = vld [vmem:[#allocation7 + $0x8] sm:$0xff]   ;;  %1287 = vmatprep.subr.bf16.mxu0 %v1665_v8  ;;  %1291 = vmatprep.mubr.msk.bf16.mxu0 %vm1666_vm1, %v1665_v8  ;;  %s1668_s25 = smov 96   ;;  %s1669_s26 = smov 88  }
  0x68   : > { %367 = vadd.xlane.f32.xlu0 %v366_v1  ;;  %1288 = vmatpush3.bf16.msra.mxu0 %v1459_v7  ;;  %v1237_v14 = vld [vmem:[%s2029_s2] ss:$0 sm:$0xff]  ;;  %vm472_vm2 = vcmask 64512   ;;  %v1910_v32 = vld [vmem:[#allocation5] sm:$0xff]  ;;  %s1670_s20 = smov 56   ;;  %s1671_s15 = smov 64  }
  0x69   : > { %1295 = vmatprep.subr.bf16.mxu1 %v1665_v8  ;;  %1289 = vmatprep.subr.bf16.mxu0 %v1665_v8  ;;  %v1238_v16 = vld [vmem:[%s2030_s3] ss:$0 sm:$0xff]  ;;  %s1672_s24 = smov 80   ;;  %s1673_s4 = smov 112   ;;  %vm536_vm3 = vcmask 1043456  }
  0x6a   : > { %1297 = vmatprep.mubr.msk.bf16.mxu1 %vm1666_vm1, %v1665_v8  ;;  %v1239_v20 = vld [vmem:[%s2032_s5] ss:$0 sm:$0xff]  ;;  %s1674_s6 = smov 48   ;;  %s1675_s11 = smov 104  }
  0x6b   : > { %s1676_s13 = smov 72   ;;  %s1677_s14 = smov 40  }
  0x6c   : > { %1290 = vmatpush3.bf16.msra.mxu0 %v1460_v9  ;;  %s1257_s21 = sshll.u32 %s1745_s9, 7  ;;  %p2059_p12 = scmp.ne.s32.totalorder %s2051_s23, 0 }
  0x6d   : > { %1301 = vmatprep.subr.bf16.mxu0 %v1665_v8  ;;  %s1678_s9 = smov [#allocation10]  }
  0xf1   : > { %v368_v2 = vpop.xlane.xlu0 %367 }
  0xf2   : > { %v370_v3 = vmul.f32 0.03125, %v368_v2 }
  0xf4   : > { %v371_v4 = vsub.f32 %v1868_v0, %v370_v3 }
  0xf6   : > { %v372_v5 = vmul.f32 %v371_v4, %v371_v4 }
  0xf8   : > { %v373_v6 = vsel %vm365_vm0, %v372_v5, 0.0 }
  0xf9   : > { %374 = vadd.xlane.f32.xlu0 %v373_v6  ;;  %v466_v6 = vld [vmem:[#allocation8 + $0x4] sm:$0xf] }
  0xfa   : > { %v696_v7 = vsel %vm536_vm3, %v466_v6, 0 }
 0x182   : > { %v375_v10 = vpop.xlane.xlu0 %374 }
 0x183   : > { %v376_v11 = vmul.f32 0.03125, %v375_v10 }
 0x185   : > { %v377_v12 = vadd.f32 1e-05, %v376_v11 }
 0x187   : > { %1461 = vrsqrt.f32 %v377_v12 }
 0x194   : > { %v1462_v13 = vpop.eup %1461 }
 0x195   : > { %v379_v15 = vmul.f32 %v1462_v13, %v371_v4  ;;  %v465_v4 = vld [vmem:[#allocation8] sm:$0xf] }
 0x196   : > { %v742_v5 = vsel %vm536_vm3, %v465_v4, 0 }
 0x197   : > { %v387_v17 = vmul.f32 %v1237_v14, %v379_v15 }
 0x199   : > { %v395_v18 = vadd.f32 %v1238_v16, %v387_v17 }
 0x19b   : > { %v396_v19 = vpack.c.bf16 %v395_v18, %v395_v18 }
 0x19d   : > { %1292 = vmatmul.mubr.msk.bf16.vlgmr.msra.gmra.mxu0 %vm365_vm0, %v396_v19 }
 0x19e   : > { %1303 = vmatprep.mubr.msk.bf16.mxu0 %vm1666_vm1, %v1665_v8 }
 0x25d   : > { %v457_v21 = vpop.f32.mrf.mxu0 }
 0x25e   : > { %v458_v22 = vadd.f32 %v1239_v20, %v457_v21 }
 0x25f   : > { %v1293_v23 = vpop.f32.mrf.mxu0 }
 0x260   : > { %v1894_v24 = vpack.c.bf16 %v458_v22, %v458_v22 }
 0x261   : > { %v460_v25 = vpop.f32.mrf.mxu0 }
 0x262   : > { %581 = vrot.lane.b32.xlu0 %v1894_v24, %s1667_s10  ;;  %470 = vrot.lane.b32.xlu1 %v1894_v24, %s1668_s25  ;;  %s362_s10 = scalar_lea.vmem [#allocation10], %s1232_s18  ;;  %s1589_s18 = sshll.u32 %s1678_s9, 4  ;;  %s1590_s18 = int_to_ptr.vmem [resolvable:$false] %s1589_s18 }
 0x263   : > { %v1294_v26 = vpop.f32.mrf.mxu0  ;;  %s1124_s25 = sshll.u32 %s362_s10, 4  ;;  %s1125_s25 = int_to_ptr.vmem [resolvable:$true] %s1124_s25 }
 0x264   : > { %p1592_p13 = scmp.lt.s32.totalorder %s1125_s25, %s1590_s18 }
 0x266   : > { %583 = vrot.lane.b32.xlu1 %v1894_v24, %s1669_s26 }
 0x2d4   : > { %v471_v27 = vpop.permute.xlu1 %470  ;;  %v582_v31 = vpop.permute.xlu0 %581 }
 0x2d5   : > { %v477_v28 = vsel %vm472_vm2, %v471_v27, 0 }
 0x2d6   : > { %1296 = vmatpush3.bf16.xpose.msra.mxu1 %v477_v28 }
 0x2d7   : > { %1307 = vmatprep.subr.bf16.mxu1 %v1665_v8 }
 0x2d8   : > { %v584_v29 = vpop.permute.xlu1 %583 }
 0x2d9   : > { %v589_v30 = vsel %vm472_vm2, %v584_v29, 0 }
 0x2dd   : > { %1298 = vmatmul.mubr.msk.bf16.vlgmr.msra.gmra.mxu1 %vm472_vm2, %v1894_v24 }
 0x2de   : > { %1308 = vmatpush3.bf16.xpose.msra.mxu1 %v589_v30  ;;  %1309 = vmatprep.mubr.msk.bf16.mxu1 %vm1666_vm1, %v1665_v8 }
 0x2df   : > { %1319 = vmatprep.subr.bf16.mxu1 %v1665_v8 }
 0x2e5   : > { %1310 = vmatmul.mubr.msk.bf16.vlgmr.msra.gmra.mxu1 %vm472_vm2, %v582_v31 }
 0x2e6   : > { %1321 = vmatprep.mubr.msk.bf16.mxu1 %vm1666_vm1, %v1665_v8  ;;  %1320 = vmatpush3.bf16.msra.mxu1 %v696_v7 }
 0x2e7   : > { %1331 = vmatprep.subr.bf16.mxu1 %v1665_v8 }
 0x39d   : > { %v513_v33 = vpop.f32.mrf.mxu1 }
 0x39e   : > { %v514_v34 = vadd.f32 %v513_v33, %v1910_v32 }
 0x39f   : > { %v1299_v35 = vpop.f32.mrf.mxu1 }
 0x3a0   : > { %v519_v36 = vsel %vm472_vm2, %v514_v34, -inf }
 0x3a1   : > { %520 = vmax.xlane.f32.xlu1 %v519_v36  ;;  %v516_v37 = vpop.f32.mrf.mxu1 }
 0x3a3   : > { %v1300_v38 = vpop.f32.mrf.mxu1 }
 0x3a5   : > { %v625_v39 = vpop.f32.mrf.mxu1 }
 0x3a6   : > { %v626_v40 = vadd.f32 %v625_v39, %v1910_v32 }
 0x3a7   : > { %v1311_v41 = vpop.f32.mrf.mxu1 }
 0x3a8   : > { %v631_v42 = vsel %vm472_vm2, %v626_v40, -inf }
 0x3a9   : > { %632 = vmax.xlane.f32.xlu0 %v631_v42  ;;  %v628_v43 = vpop.f32.mrf.mxu1 }
 0x3ab   : > { %v1312_v44 = vpop.f32.mrf.mxu1 }
 0x3bf   : > { %643 = vrot.lane.b32.xlu0 %v1894_v24, %s1670_s20 }
 0x42a   : > { %v521_v45 = vpop.xlane.xlu1 %520 }
 0x42b   : > { %v522_v46 = vsub.f32 %v514_v34, %v521_v45 }
 0x42d   : > { %v523_v47 = vmul.f32 1.442695, %v522_v46 }
 0x42f   : > { %1463 = vpow2.f32 %v523_v47 }
 0x432   : > { %v633_v48 = vpop.xlane.xlu0 %632 }
 0x433   : > { %v634_v49 = vsub.f32 %v626_v40, %v633_v48 }
 0x435   : > { %v635_v50 = vmul.f32 1.442695, %v634_v49 }
 0x436   : > { %v644_v61 = vpop.permute.xlu0 %643 }
 0x437   : > { %1465 = vpow2.f32 %v635_v50  ;;  %v649_v63 = vsel %vm536_vm3, %v644_v61, 0 }
 0x43c   : > { %v1464_v51 = vpop.eup %1463 }
 0x43d   : > { %v525_v52 = vsel %vm472_vm2, %v1464_v51, 0.0 }
 0x43e   : > { %526 = vadd.xlane.f32.xlu1 %v525_v52 }
 0x444   : > { %v1466_v53 = vpop.eup %1465 }
 0x445   : > { %v637_v54 = vsel %vm472_vm2, %v1466_v53, 0.0 }
 0x446   : > { %638 = vadd.xlane.f32.xlu1 %v637_v54 }
 0x457   : > { %531 = vrot.lane.b32.xlu1 %v1894_v24, %s1671_s15  ;;  %s1989_s15 = scalar_lea.hbm %s2035_s8, %s1257_s21 }
 0x45b   : > { %786 = vrot.lane.b32.xlu1 %v1894_v24, %s1672_s24  ;;  %s1111_s24 = scalar_lea.sflag [#allocation4], %s1850_s1 }
 0x45f   : > { %784 = vrot.lane.b32.xlu1 %v1894_v24, %s1673_s4  ;;  %s1585_s4 = scalar_lea.vmem %s1125_s25, 128 }
 0x460   : > { %p1586_p8 = scmp.ne.s32.totalorder %s1125_s25, %s1585_s4 }
 0x462   : > { %p1587_p7 = pnand %p1586_p8, %p2059_p12 }
 0x464   : > { %p1588_p10 = pneg %p1587_p7 }
 0x4c7   : > { %v527_v55 = vpop.xlane.xlu1 %526 }
 0x4c8   : > { %1467 = vrcp.f32 %v527_v55 }
 0x4cf   : > { %v639_v56 = vpop.xlane.xlu1 %638 }
 0x4d0   : > { %1469 = vrcp.f32 %v639_v56 }
 0x4d3   : > { %v532_v57 = vpop.permute.xlu1 %531 }
 0x4d4   : > { %v538_v58 = vsel %vm536_vm3, %v532_v57, 0 }
 0x4d5   : > { %v1468_v59 = vpop.eup %1467  ;;  %1302 = vmatpush3.bf16.msra.mxu0 %v538_v58 }
 0x4d6   : > { %1313 = vmatprep.subr.bf16.mxu0 %v1665_v8  ;;  %v529_v60 = vmul.f32 %v1468_v59, %v1464_v51 }
 0x4d7   : > { %v787_v14 = vpop.permute.xlu1 %786 }
 0x4d8   : > { %v530_v62 = vpack.c.bf16 %v529_v60, %v529_v60  ;;  %v792_v18 = vsel %vm472_vm2, %v787_v14, 0 }
 0x4da   : > { %1304 = vmatmul.mubr.msk.bf16.vlgmr.msra.gmra.mxu0 %vm472_vm2, %v530_v62 }
 0x4db   : > { %1314 = vmatpush3.bf16.msra.mxu0 %v649_v63  ;;  %1315 = vmatprep.mubr.msk.bf16.mxu0 %vm1666_vm1, %v1665_v8  ;;  %v785_v21 = vpop.permute.xlu1 %784 }
 0x4dc   : > { %1325 = vmatprep.subr.bf16.mxu0 %v1665_v8 }
 0x4dd   : > { %v1470_v1 = vpop.eup %1469 }
 0x4de   : > { %v641_v2 = vmul.f32 %v1470_v1, %v1466_v53  ;;  %v467_v53 = vld [vmem:[#allocation8 + $0x8] sm:$0xf] }
 0x4df   : > { %v899_v54 = vsel %vm536_vm3, %v467_v53, 0 }
 0x4e0   : > { %v642_v3 = vpack.c.bf16 %v641_v2, %v641_v2 }
 0x4e2   : > { %1316 = vmatmul.mubr.msk.bf16.vlgmr.msra.gmra.mxu0 %vm472_vm2, %v642_v3 }
 0x4e3   : > { %1327 = vmatprep.mubr.msk.bf16.mxu0 %vm1666_vm1, %v1665_v8  ;;  %1326 = vmatpush3.bf16.msra.mxu0 %v742_v5 }
 0x4e4   : > { %1337 = vmatprep.subr.bf16.mxu0 %v1665_v8 }
 0x59a   : > { %v574_v9 = vpop.f32.mrf.mxu0 }
 0x59b   : > { %v580_v10 = vpack.c.bf16 %v574_v9, %v574_v9 }
 0x59c   : > { %v1305_v11 = vpop.f32.mrf.mxu0 }
 0x59d   : > { %1328 = vmatmul.mubr.msk.bf16.vlgmr.msra.gmra.mxu0 %vm472_vm2, %v580_v10  ;;  %v468_v10 = vld [vmem:[#allocation8 + $0xc] sm:$0xf] }
 0x59e   : > { %v577_v12 = vpop.f32.mrf.mxu0  ;;  %1339 = vmatprep.mubr.msk.bf16.mxu0 %vm1666_vm1, %v1665_v8  ;;  %v1057_v11 = vsel %vm536_vm3, %v468_v10, 0 }
 0x5a0   : > { %v1306_v13 = vpop.f32.mrf.mxu0 }
 0x5a2   : > { %v685_v15 = vpop.f32.mrf.mxu0 }
 0x5a3   : > { %v691_v16 = vpack.c.bf16 %v685_v15, %v685_v15 }
 0x5a4   : > { %v1317_v17 = vpop.f32.mrf.mxu0 }
 0x5a5   : > { %1322 = vmatmul.mubr.msk.bf16.vlgmr.msra.gmra.mxu1 %vm472_vm2, %v691_v16 }
 0x5a6   : > { %1332 = vmatpush3.bf16.xpose.msra.mxu1 %v792_v18  ;;  %v688_v19 = vpop.f32.mrf.mxu0  ;;  %1333 = vmatprep.mubr.msk.bf16.mxu1 %vm1666_vm1, %v1665_v8 }
 0x5a7   : > { %1343 = vmatprep.subr.bf16.mxu1 %v1665_v8 }
 0x5a8   : > { %v1318_v20 = vpop.f32.mrf.mxu0 }
 0x5ad   : > { %1334 = vmatmul.mubr.msk.bf16.vlgmr.msra.gmra.mxu1 %vm472_vm2, %v785_v21 }
 0x5ae   : > { %1345 = vmatprep.mubr.msk.bf16.mxu1 %vm1666_vm1, %v1665_v8  ;;  %1344 = vmatpush3.bf16.msra.mxu1 %v899_v54 }
 0x5af   : > { %1355 = vmatprep.subr.bf16.mxu1 %v1665_v8 }
 0x65d   : > { %v778_v22 = vpop.f32.mrf.mxu0 }
 0x65f   : > { %v1329_v23 = vpop.f32.mrf.mxu0 }
 0x661   : > { %v781_v25 = vpop.f32.mrf.mxu0 }
 0x663   : > { %v1330_v26 = vpop.f32.mrf.mxu0 }
 0x665   : > { %v732_v27 = vpop.f32.mrf.mxu1 }
 0x666   : > { %v1947_v28 = vadd.f32 %v778_v22, %v732_v27  ;;  %v1255_v27 = vld [vmem:[%s2034_s7] ss:$0 sm:$0xff] }
 0x667   : > { %v1323_v29 = vpop.f32.mrf.mxu1 }
 0x669   : > { %v735_v30 = vpop.f32.mrf.mxu1 }
 0x66b   : > { %v1324_v31 = vpop.f32.mrf.mxu1 }
 0x66d   : > { %v828_v33 = vpop.f32.mrf.mxu1 }
 0x66e   : > { %v829_v34 = vadd.f32 %v828_v33, %v1910_v32 }
 0x66f   : > { %v1335_v35 = vpop.f32.mrf.mxu1 }
 0x670   : > { %v834_v36 = vsel %vm472_vm2, %v829_v34, -inf }
 0x671   : > { %835 = vmax.xlane.f32.xlu1 %v834_v36  ;;  %v831_v37 = vpop.f32.mrf.mxu1 }
 0x673   : > { %v1336_v38 = vpop.f32.mrf.mxu1 }
 0x682   : > { %846 = vrot.lane.b32.xlu1 %v1894_v24, %s1674_s6  ;;  %s1591_s6 = scalar_lea.vmem %s1590_s18, 256 }
 0x683   : > { %p1593_p0 = scmp.lt.s32.totalorder %s1591_s6, %s1585_s4 }
 0x685   : > { %p1594_p1 = por %p1593_p0, %p1592_p13 }
 0x686   : > { %942 = vrot.lane.b32.xlu1 %v1894_v24, %s1675_s11 }
 0x687   : > { %p1595_p3 = pnand %p1594_p1, %p1588_p10 }
 0x6fa   : > { %v836_v39 = vpop.xlane.xlu1 %835 }
 0x6fb   : > { %v837_v40 = vsub.f32 %v829_v34, %v836_v39 }
 0x6fd   : > { %v838_v41 = vmul.f32 1.442695, %v837_v40 }
 0x6fe   : > { %v847_v42 = vpop.permute.xlu1 %846 }
 0x6ff   : > { %1471 = vpow2.f32 %v838_v41  ;;  %v852_v43 = vsel %vm536_vm3, %v847_v42, 0 }
 0x700   : > { %1338 = vmatpush3.bf16.msra.mxu0 %v852_v43 }
 0x701   : > { %1349 = vmatprep.subr.bf16.mxu0 %v1665_v8 }
 0x702   : > { %v943_v52 = vpop.permute.xlu1 %942 }
 0x70c   : > { %v1472_v44 = vpop.eup %1471 }
 0x70d   : > { %v840_v45 = vsel %vm472_vm2, %v1472_v44, 0.0 }
 0x70e   : > { %841 = vadd.xlane.f32.xlu0 %v840_v45 }
 0x724   : > { %944 = vrot.lane.b32.xlu0 %v1894_v24, %s1676_s13 }
 0x797   : > { %v842_v46 = vpop.xlane.xlu0 %841 }
 0x798   : > { %1473 = vrcp.f32 %v842_v46 }
 0x79b   : > { %v945_v49 = vpop.permute.xlu0 %944 }
 0x79c   : > { %v950_v51 = vsel %vm472_vm2, %v945_v49, 0 }
 0x7a5   : > { %v1474_v47 = vpop.eup %1473 }
 0x7a6   : > { %v844_v48 = vmul.f32 %v1474_v47, %v1472_v44 }
 0x7a8   : > { %v845_v50 = vpack.c.bf16 %v844_v48, %v844_v48 }
 0x7aa   : > { %1340 = vmatmul.mubr.msk.bf16.vlgmr.msra.gmra.mxu0 %vm472_vm2, %v845_v50 }
 0x7ab   : > { %1350 = vmatpush3.bf16.xpose.msra.mxu0 %v950_v51  ;;  %1351 = vmatprep.mubr.msk.bf16.mxu0 %vm1666_vm1, %v1665_v8 }
 0x7ac   : > { %1361 = vmatprep.subr.bf16.mxu0 %v1665_v8 }
 0x7b2   : > { %1352 = vmatmul.mubr.msk.bf16.vlgmr.msra.gmra.mxu0 %vm472_vm2, %v943_v52 }
 0x7b3   : > { %1363 = vmatprep.mubr.msk.bf16.mxu0 %vm1666_vm1, %v1665_v8  ;;  %1362 = vmatpush3.bf16.msra.mxu0 %v1057_v11 }
 0x86a   : > { %v888_v55 = vpop.f32.mrf.mxu0 }
 0x86b   : > { %v894_v56 = vpack.c.bf16 %v888_v55, %v888_v55 }
 0x86c   : > { %v1341_v57 = vpop.f32.mrf.mxu0 }
 0x86d   : > { %1346 = vmatmul.mubr.msk.bf16.vlgmr.msra.gmra.mxu1 %vm472_vm2, %v894_v56 }
 0x86e   : > { %v891_v58 = vpop.f32.mrf.mxu0  ;;  %1357 = vmatprep.mubr.msk.bf16.mxu1 %vm1666_vm1, %v1665_v8 }
 0x870   : > { %v1342_v59 = vpop.f32.mrf.mxu0 }
 0x872   : > { %v986_v60 = vpop.f32.mrf.mxu0 }
 0x873   : > { %v987_v61 = vadd.f32 %v986_v60, %v1910_v32 }
 0x874   : > { %v1353_v62 = vpop.f32.mrf.mxu0 }
 0x875   : > { %v992_v63 = vsel %vm472_vm2, %v987_v61, -inf }
 0x876   : > { %993 = vmax.xlane.f32.xlu1 %v992_v63  ;;  %v989_v1 = vpop.f32.mrf.mxu0 }
 0x878   : > { %v1354_v2 = vpop.f32.mrf.mxu0 }
 0x8ff   : > { %v994_v3 = vpop.xlane.xlu1 %993 }
 0x900   : > { %v995_v4 = vsub.f32 %v987_v61, %v994_v3 }
 0x902   : > { %v996_v5 = vmul.f32 1.442695, %v995_v4 }
 0x904   : > { %1475 = vpow2.f32 %v996_v5 }
 0x911   : > { %v1476_v6 = vpop.eup %1475 }
 0x912   : > { %v998_v7 = vsel %vm472_vm2, %v1476_v6, 0.0 }
 0x913   : > { %999 = vadd.xlane.f32.xlu0 %v998_v7 }
 0x929   : > { %1004 = vrot.lane.b32.xlu0 %v1894_v24, %s1677_s14 }
 0x92d   : > { %v935_v8 = vpop.f32.mrf.mxu1 }
 0x92e   : > { %v941_v32 = vadd.f32 %v935_v8, %v1947_v28 }
 0x92f   : > { %v1347_v9 = vpop.f32.mrf.mxu1 }
 0x931   : > { %v938_v12 = vpop.f32.mrf.mxu1 }
 0x933   : > { %v1348_v13 = vpop.f32.mrf.mxu1 }
 0x99c   : > { %v1000_v14 = vpop.xlane.xlu0 %999 }
 0x99d   : > { %1477 = vrcp.f32 %v1000_v14 }
 0x9a0   : > { %v1005_v15 = vpop.permute.xlu0 %1004 }
 0x9a1   : > { %v1010_v16 = vsel %vm536_vm3, %v1005_v15, 0 }
 0x9a2   : > { %1356 = vmatpush3.bf16.msra.mxu1 %v1010_v16 }
 0x9aa   : > { %v1478_v17 = vpop.eup %1477 }
 0x9ab   : > { %v1002_v24 = vmul.f32 %v1478_v17, %v1476_v6 }
 0x9ad   : > { %v1003_v18 = vpack.c.bf16 %v1002_v24, %v1002_v24 }
 0x9af   : > { %1358 = vmatmul.mubr.msk.bf16.vlgmr.msra.gmra.mxu1 %vm472_vm2, %v1003_v18 }
 0xa6f   : > { %v1046_v19 = vpop.f32.mrf.mxu1 }
 0xa70   : > { %v1052_v20 = vpack.c.bf16 %v1046_v19, %v1046_v19 }
 0xa71   : > { %v1359_v21 = vpop.f32.mrf.mxu1 }
 0xa72   : > { %1364 = vmatmul.mubr.msk.bf16.vlgmr.msra.gmra.mxu0 %vm472_vm2, %v1052_v20 }
 0xa73   : > { %v1049_v22 = vpop.f32.mrf.mxu1 }
 0xa75   : > { %v1360_v23 = vpop.f32.mrf.mxu1 }
 0xb32   : > { %v1093_v25 = vpop.f32.mrf.mxu0 }
 0xb33   : > { %v1099_v26 = vadd.f32 %v1093_v25, %v941_v32 }
 0xb34   : > { %v1365_v28 = vpop.f32.mrf.mxu0 }
 0xb35   : > { %v1100_v29 = vadd.f32 %v1099_v26, %v1868_v0 }
 0xb36   : > { %v1096_v30 = vpop.f32.mrf.mxu0 }
 0xb37   : > { %v1108_v31 = vadd.f32 %v1255_v27, %v1100_v29 }
 0xb38   : > { %v1366_v33 = vpop.f32.mrf.mxu0 }
 0xb39   : > { %1109 = vst.msk [vmem:[%s362_s10] sm:$0xff] %vm365_vm0, %v1108_v31 }
 0xb3a   : > { %1598 = shalt.err (!%p1595_p3)
}
 0xb3b   : > { %s1599_s11 = scalar_lea.hbm %s1989_s15, 128  ;;  %s1603_s14 = scalar_lea.hbm %s2035_s8, 256 }
 0xb3c   : > { %p1600_p5 = scmp.ne.s32.totalorder %s1989_s15, %s1599_s11  ;;  %p1604_p11 = scmp.lt.s32.totalorder %s1989_s15, %s2035_s8 }
 0xb3d   : > { %p1605_p4 = scmp.lt.s32.totalorder %s1603_s14, %s1599_s11 }
 0xb3e   : > { %p1601_p2 = pnand %p1600_p5, %p2059_p12 }
 0xb3f   : > { %p1606_p6 = por %p1605_p4, %p1604_p11 }
 0xb40   : > { %p1602_p9 = pneg %p1601_p2 }
 0xb42   : > { %p1607_p8 = pnand %p1606_p6, %p1602_p9 }
 0xb44   : > { %1610 = shalt.err (!%p1607_p8)
}
 0xb45   : > { %1381 = dma.vmem_to_hbm [thread:$0]  (%p2059_p12), %s1125_s25, 128, %s1989_s15, %s1111_s24  }
 0xb46 PF: > { %s1136_s21 = sand.u32 1, %s1645_s27   ;;  %p2060_p7 = scmp.ne.s32.totalorder %s2044_s12, 0 }
 0xb47   : > { %p2061_p10 = scmp.ge.s32.totalorder %s1657_s30, 2  ;;  %s1137_s10 = scalar_lea.sflag [#allocation4], %s1136_s21 }
 0xb49   : > { %p1398_p13 = pnand %p2061_p10, %p2060_p7 }
 0xb4b   : > { %p1399_p0 = pneg %p1398_p13 }
 0xb4d   : > { %1640 = dma.done.wait (%p1399_p0), %s1137_s10, 128  }
 0xb4e   : > { %1642 = vsyncadd (%p1399_p0), %s1137_s10, 4294967168  ;;  %p23_p1 = scmp.ge.s32.totalorder %s1804_s17, 4   ;;  %s2062_s27 = smov %s1649_s28 }
 0xb4f   : > { %s2063_s28 = smov %s1653_s29  ;;  %s2064_s29 = smov %s1814_s22 }
 0xb50   : > { %s2065_s30 = smov %s1804_s17  ;;  %25 = sbr.rel (!%p23_p1) target bundleno = 11 (0xb), region = 109 }
 0xb55   :  { %1142 = vsyncpa [#allocation3], 1 }
 0xb56   :  { %1144 = vsyncpa [#allocation3 + $0x1], 1 }
 0xb57   :  { %1145 = vsyncpa [#allocation6], 1 }
 0xb58   :  { %1146 = vsyncpa [#allocation9], 1 }
 0xb59   :  { %1147 = vsyncpa [#allocation4], 1 }
 0xb5a   :  { %1149 = vsyncpa [#allocation4 + $0x1], 1 }

</bundles_post_ra>
